<compile_context>
chip_gen: v6e
topology: v6e:2x2x1
jax: 0.10.0
libtpu: 0.0.40
codegen_flags: <defaults>
</compile_context>

<pallas_src>
import jax
import jax.numpy as jnp
from jax.experimental import pallas as pl
from jax.experimental.pallas import tpu as pltpu


def _round_up(a, b):
    return (a + b - 1) // b * b


def _gemm_bias_relu_kernel(p_ref, w_ref, b_ref, o_ref):
    """One M-tile of the im2col GEMM + bias + ReLU.

    p_ref: (TM, K)   im2col patches tile (true K, no HBM padding)
    w_ref: (K,  O)   weights, constant across grid
    b_ref: (1,  O)   bias, constant across grid
    o_ref: (TM, O)   unpadded output tile
    """
    acc = jnp.dot(p_ref[...], w_ref[...], preferred_element_type=jnp.float32)
    acc = acc + b_ref[...]                 # (1, O) broadcasts over (TM, O)
    o_ref[...] = jnp.maximum(acc, 0.0).astype(o_ref.dtype)


def conv_relu(x_nchw, weight_oihw, bias, *, stride=1, padding=1,
              num_blocks=2, max_tm=1024, compute_dtype=None):
    """Equivalent of Conv(in, out, k, stride, padding, activation='relu').forward."""
    N, C, H, W = x_nchw.shape
    O, C_w, KH, KW = weight_oihw.shape
    assert C == C_w
    OH = (H + 2 * padding - KH) // stride + 1
    OW = (W + 2 * padding - KW) // stride + 1
    K = C * KH * KW
    M = N * OH * OW

    # ---- wrapper-side im2col: one fused XLA op (identity-kernel grouped conv) ----
    # Output feature index = c*(KH*KW) + kh*KW + kw, matching weight.reshape(O, K).
    patches = jax.lax.conv_general_dilated_patches(
        x_nchw, filter_shape=(KH, KW),
        window_strides=(stride, stride),
        padding=[(padding, padding), (padding, padding)])        # (N, K, OH, OW)
    patches = jnp.transpose(patches, (0, 2, 3, 1)).reshape(M, K)  # (M, K), lane dim = K

    w2 = weight_oihw.reshape(O, K).T                              # (K, O), same feature order
    b2 = bias.reshape(1, O).astype(jnp.float32)

    if compute_dtype is not None:
        patches = patches.astype(compute_dtype)
        w2 = w2.astype(compute_dtype)
    else:
        w2 = w2.astype(jnp.float32)

    # ---- tiling: a couple of large M blocks (2 by default -> both TCs on v7x) ----
    tm = _round_up(max(1, -(-M // num_blocks)), 8)   # ceil(M / num_blocks), mult of 8
    tm = min(tm, max_tm)
    Mp = _round_up(M, tm)
    if Mp != M:
        patches = jnp.pad(patches, ((0, Mp - M), (0, 0)))  # zero rows, sliced off below

    out = pl.pallas_call(
        _gemm_bias_relu_kernel,
        out_shape=jax.ShapeDtypeStruct((Mp, O), x_nchw.dtype),
        grid_spec=pltpu.PrefetchScalarGridSpec(
            num_scalar_prefetch=0,
            grid=(Mp // tm,),
            in_specs=[
                pl.BlockSpec((tm, K), lambda i: (i, 0)),   # last dim == full K (no pad)
                pl.BlockSpec((K, O), lambda i: (0, 0)),    # whole (tiny) weight each step
                pl.BlockSpec((1, O), lambda i: (0, 0)),
            ],
            out_specs=pl.BlockSpec((tm, O), lambda i: (i, 0)),    # unpadded output
        ),
        compiler_params=pltpu.CompilerParams(
            dimension_semantics=("parallel",),
            vmem_limit_bytes=32 * 1024 * 1024,   # ~90 KiB/step here; safe on v7x's 64 MiB VMEM
        ),
    )(patches, w2, b2)

    # slice off M padding, back to NCHW (cheap metadata / small transpose in XLA)
    y = out[:M].reshape(N, OH, OW, O)
    return jnp.transpose(y, (0, 3, 1, 2))


def _reference(x_nchw, weight_oihw, bias, *, stride, padding):
    y = jax.lax.conv_general_dilated(
        x_nchw, weight_oihw,
        window_strides=(stride, stride),
        padding=[(padding, padding), (padding, padding)],
        dimension_numbers=("NCHW", "OIHW", "NCHW"))
    y = y + bias[None, :, None, None]
    return jnp.maximum(y, 0.0)


if __name__ == "__main__":
    # Module config: Conv(in_channels=4, out_channels=8, kernel_size=3, stride=1, padding=1)
    N, Cin, H, W = 2, 4, 16, 16
    Cout, Ksz = 8, 3
    stride, padding = 1, 1

    key = jax.random.PRNGKey(0)
    kx, kw = jax.random.split(key)

    x = jax.random.normal(kx, (N, Cin, H, W), dtype=jnp.float32)

    # Deterministic Kaiming-normal init for ReLU (fan_in): std = sqrt(2 / fan_in).
    fan_in = Cin * Ksz * Ksz
    w = jax.random.normal(kw, (Cout, Cin, Ksz, Ksz), dtype=jnp.float32) * jnp.sqrt(2.0 / fan_in)
    b = jnp.zeros((Cout,), dtype=jnp.float32)  # bias.data.zero_()

    y = conv_relu(x, w, b, stride=stride, padding=padding)
    y = jax.block_until_ready(y)

    y_ref = _reference(x, w, b, stride=stride, padding=padding)
    assert y.shape == (N, Cout, H, W), y.shape
    assert jnp.allclose(y, y_ref, atol=1e-4, rtol=1e-4), float(jnp.max(jnp.abs(y - y_ref)))

    print("KERNEL_OK")
</pallas_src>

<mosaic_0001>
module attributes {stable_mosaic.version = 11 : i64} {
  func.func @_gemm_bias_relu_kernel(%arg0: i32, %arg1: memref<256x36xf32, #tpu.memory_space<vmem>>, %arg2: memref<36x8xf32, #tpu.memory_space<vmem>>, %arg3: memref<1x8xf32, #tpu.memory_space<vmem>>, %arg4: memref<256x8xf32, #tpu.memory_space<vmem>>) attributes {dimension_semantics = [#tpu.dimension_semantics<parallel>], iteration_bounds = array<i64: 2>, scalar_prefetch = 0 : i64, scratch_operands = 0 : i64, tpu.core_type = #tpu.core_type<tc>, window_params = [{transform_indices = @transform_0, window_bounds = array<i64: 256, 36>}, {pipeline_mode = #tpu.pipeline_mode<synchronous>, transform_indices = @transform_1, window_bounds = array<i64: 36, 8>}, {pipeline_mode = #tpu.pipeline_mode<synchronous>, transform_indices = @transform_2, window_bounds = array<i64: 1, 8>}, {transform_indices = @transform_3, window_bounds = array<i64: 256, 8>}]} {
    %c0 = arith.constant 0 : index
    %c0_0 = arith.constant 0 : index
    %0 = vector.load %arg1[%c0, %c0_0] : memref<256x36xf32, #tpu.memory_space<vmem>>, vector<256x36xf32>
    %c0_1 = arith.constant 0 : index
    %c0_2 = arith.constant 0 : index
    %1 = vector.load %arg2[%c0_1, %c0_2] : memref<36x8xf32, #tpu.memory_space<vmem>>, vector<36x8xf32>
    %cst = arith.constant dense<0.000000e+00> : vector<256x8xf32>
    %2 = tpu.matmul %0, %1, %cst {dimension_numbers = #tpu.dot_dimension_numbers<[1], [0], [0], [1], [0, 0, 1, 1], [], []>} : vector<256x36xf32>, vector<36x8xf32>, vector<256x8xf32> -> vector<256x8xf32>
    %c0_3 = arith.constant 0 : index
    %c0_4 = arith.constant 0 : index
    %3 = vector.load %arg3[%c0_3, %c0_4] : memref<1x8xf32, #tpu.memory_space<vmem>>, vector<1x8xf32>
    %4 = vector.broadcast %3 : vector<1x8xf32> to vector<256x8xf32>
    %5 = arith.addf %2, %4 : vector<256x8xf32>
    %cst_5 = arith.constant 0.000000e+00 : f32
    %6 = vector.broadcast %cst_5 : f32 to vector<256x8xf32>
    %7 = arith.maximumf %5, %6 : vector<256x8xf32>
    %c0_6 = arith.constant 0 : index
    %c0_7 = arith.constant 0 : index
    %8 = vector.load %arg4[%c0_6, %c0_7] : memref<256x8xf32, #tpu.memory_space<vmem>>, vector<256x8xf32>
    tpu.vector_store %arg4[%c0_6, %c0_7], %7 {strides = array<i32>} : memref<256x8xf32, #tpu.memory_space<vmem>>, vector<256x8xf32>,
    return
  }
  func.func @transform_0(%arg0: i32) -> (i32, i32) {
    %c0_i32 = arith.constant 0 : i32
    %c0_i32_0 = arith.constant 0 : i32
    return %arg0, %c0_i32 : i32, i32
  }
  func.func @transform_1(%arg0: i32) -> (i32, i32) {
    %c0_i32 = arith.constant 0 : i32
    %c0_i32_0 = arith.constant 0 : i32
    %c0_i32_1 = arith.constant 0 : i32
    return %c0_i32, %c0_i32_0 : i32, i32
  }
  func.func @transform_2(%arg0: i32) -> (i32, i32) {
    %c0_i32 = arith.constant 0 : i32
    %c0_i32_0 = arith.constant 0 : i32
    %c0_i32_1 = arith.constant 0 : i32
    return %c0_i32, %c0_i32_0 : i32, i32
  }
  func.func @transform_3(%arg0: i32) -> (i32, i32) {
    %c0_i32 = arith.constant 0 : i32
    %c0_i32_0 = arith.constant 0 : i32
    return %arg0, %c0_i32 : i32, i32
  }
}

</mosaic_0001>

<bundles_post_ra>
// kernel: tpu_custom_call.1
= control target key start
LH: loop header
LB: loop body
LE: loop exit
PB: predicated region body
PF: predicated region fallthrough
CT: control target
= control target key end

     0   :  { %s851_s12 = smov 0   ;;  %s1059_s0 = inlined_call_operand.vmem [shape: f32[512,36], index: 0, kind: input, shape index: {}]   ;;  %s1060_s1 = inlined_call_operand.vmem [shape: f32[36,8], index: 1, kind: input, shape index: {}]   ;;  %s1061_s2 = inlined_call_operand.vmem [shape: f32[1,8], index: 2, kind: input, shape index: {}]   ;;  %s1062_s3 = inlined_call_operand.vmem [shape: f32[512,8], index: 3, kind: output, shape index: {}]  }
   0x1 LB: > { %s665_s13 = sadd.s32 4294967295, %s829_s12   ;;  %p669_p0 = scmp.ge.s32.totalorder %s829_s12, 1  ;;  %s829_s12 = sphi %s851_s12, %s13_s12  }
   0x2   : > { %p138_p1 = scmp.lt.s32.totalorder %s829_s12, 3 }
   0x4   : > { %p139_p2 = pnand %p669_p0, %p138_p1 }
   0x5   : > { %s670_s18 = sshll.u32 (!%p139_p2), %s665_s13, 5 }
   0x6   : > { %142 = sbr.rel (%p139_p2) target bundleno = 251 (0xfb), region = 32  ;;  %p163_p3 = scmp.lt.s32.totalorder (!%p139_p2), %s670_s18, 63 }
   0xb   : > { %v210_v0 = vld [vmem:[%s1060_s1 + $0x20] sm:$0xf]  ;;  %vm315_vm0 = vcmask 1043456   ;;  %v209_v1 = vld [vmem:[%s1060_s1 + $0x18] sm:$0xff]  ;;  %v208_v2 = vld [vmem:[%s1060_s1 + $0x10] sm:$0xff]  ;;  %s1064_s18 = smov (!%p163_p3, %s670_s18), 63 }
   0xc   : > { %747 = vmatprep.subr.msk.mxu0 %vm315_vm0, %v210_v0  ;;  %805 = vmatprep.subr.msk.mxu1 %vm315_vm0, %v210_v0  ;;  %v207_v3 = vld [vmem:[%s1060_s1 + $0x8] sm:$0xff]  ;;  %s671_s23 = sshll.u32 %s1064_s18, 3  ;;  %v206_v4 = vld [vmem:[%s1060_s1] sm:$0xff]  ;;  %vm218_vm1 = vcmask 293888   ;;  %vm576_vm2 = vcmask 64512  }
   0xd   : > { %748 = vmatpush3.msk.msra.mxu0 %vm315_vm0, %v210_v0  ;;  %810 = vmatpush3.msk.msra.mxu1 %vm315_vm0, %v210_v0  ;;  %s882_s28 = scalar_lea.vmem %s1059_s0, %s671_s23  ;;  %v951_v37 = vld [vmem:[%s1061_s2] ss:$0 sm:$0xff]  ;;  %s960_s6 = scalar_lea.vmem %s1062_s3, %s671_s23 }
   0xe   : > { %749 = vmatprep.subr.mxu0 %v209_v1  ;;  %806 = vmatprep.subr.mxu1 %v209_v1  ;;  %v174_v5 = vld [vmem:[%s882_s28] sm:$0xff]  ;;  %v175_v7 = vld [vmem:[%s882_s28 + $0x8] sm:$0xff]  ;;  %v176_v9 = vld [vmem:[%s882_s28 + $0x10] sm:$0xff] }
   0xf   : > { %750 = vmatpush3.msra.mxu0 %v209_v1  ;;  %811 = vmatpush3.msra.mxu1 %v209_v1  ;;  %v190_v6 = vld [vmem:[%s882_s28 + $0x80] sm:$0xff]  ;;  %v191_v8 = vld [vmem:[%s882_s28 + $0x88] sm:$0xff]  ;;  %v192_v10 = vld [vmem:[%s882_s28 + $0x90] sm:$0xff] }
  0x10   : > { %751 = vmatprep.subr.mxu0 %v208_v2  ;;  %807 = vmatprep.subr.mxu1 %v208_v2  ;;  %v177_v11 = vld [vmem:[%s882_s28 + $0x18] sm:$0xff]  ;;  %v178_v13 = vld [vmem:[%s882_s28 + $0x20] sm:$0xff]  ;;  %v179_v15 = vld [vmem:[%s882_s28 + $0x28] sm:$0xff] }
  0x11   : > { %752 = vmatpush3.msra.mxu0 %v208_v2  ;;  %812 = vmatpush3.msra.mxu1 %v208_v2  ;;  %v193_v12 = vld [vmem:[%s882_s28 + $0x98] sm:$0xff]  ;;  %v194_v14 = vld [vmem:[%s882_s28 + $0xa0] sm:$0xff]  ;;  %v195_v16 = vld [vmem:[%s882_s28 + $0xa8] sm:$0xff] }
  0x12   : > { %753 = vmatprep.subr.mxu0 %v207_v3  ;;  %808 = vmatprep.subr.mxu1 %v207_v3  ;;  %v180_v17 = vld [vmem:[%s882_s28 + $0x30] sm:$0xff]  ;;  %v181_v19 = vld [vmem:[%s882_s28 + $0x38] sm:$0xff]  ;;  %v182_v21 = vld [vmem:[%s882_s28 + $0x40] sm:$0xff] }
  0x13   : > { %754 = vmatpush3.msra.mxu0 %v207_v3  ;;  %813 = vmatpush3.msra.mxu1 %v207_v3  ;;  %v196_v18 = vld [vmem:[%s882_s28 + $0xb0] sm:$0xff]  ;;  %v197_v20 = vld [vmem:[%s882_s28 + $0xb8] sm:$0xff]  ;;  %v198_v22 = vld [vmem:[%s882_s28 + $0xc0] sm:$0xff] }
  0x14   : > { %755 = vmatprep.subr.mxu0 %v206_v4  ;;  %809 = vmatprep.subr.mxu1 %v206_v4  ;;  %v183_v23 = vld [vmem:[%s882_s28 + $0x48] sm:$0xff]  ;;  %v184_v25 = vld [vmem:[%s882_s28 + $0x50] sm:$0xff]  ;;  %v185_v27 = vld [vmem:[%s882_s28 + $0x58] sm:$0xff] }
  0x15   : > { %756 = vmatpush3.msra.mxu0 %v206_v4  ;;  %814 = vmatpush3.msra.mxu1 %v206_v4  ;;  %v199_v24 = vld [vmem:[%s882_s28 + $0xc8] sm:$0xff]  ;;  %v200_v26 = vld [vmem:[%s882_s28 + $0xd0] sm:$0xff]  ;;  %v201_v28 = vld [vmem:[%s882_s28 + $0xd8] sm:$0xff] }
  0x16   : > { %757 = vmatprep.mubr.msk.f32.mxu0 %vm218_vm1, %v174_v5  ;;  %781 = vmatprep.mubr.msk.f32.mxu1 %vm218_vm1, %v190_v6  ;;  %v186_v29 = vld [vmem:[%s882_s28 + $0x60] sm:$0xff]  ;;  %v187_v31 = vld [vmem:[%s882_s28 + $0x68] sm:$0xff]  ;;  %v188_v33 = vld [vmem:[%s882_s28 + $0x70] sm:$0xff] }
  0x17   : > { %758 = vmatmul.mubr.msk.f32.vlgmr.msra.gmra.mxu0 %vm218_vm1, %v175_v7  ;;  %782 = vmatmul.mubr.msk.f32.vlgmr.msra.gmra.mxu1 %vm218_vm1, %v191_v8  ;;  %v202_v30 = vld [vmem:[%s882_s28 + $0xe0] sm:$0xff]  ;;  %v203_v32 = vld [vmem:[%s882_s28 + $0xe8] sm:$0xff]  ;;  %v204_v34 = vld [vmem:[%s882_s28 + $0xf0] sm:$0xff] }
  0x18   : > { %760 = vmatprep.mubr.msk.f32.mxu0 %vm218_vm1, %v176_v9  ;;  %784 = vmatprep.mubr.msk.f32.mxu1 %vm218_vm1, %v192_v10  ;;  %v189_v35 = vld [vmem:[%s882_s28 + $0x78] sm:$0xff] }
  0x19   : > { %v205_v36 = vld [vmem:[%s882_s28 + $0xf8] sm:$0xff] }
  0x1b   : > { %761 = vmatmul.mubr.msk.f32.gmra.mxu0 %vm218_vm1, %v177_v11  ;;  %785 = vmatmul.mubr.msk.f32.gmra.mxu1 %vm218_vm1, %v193_v12 }
  0x1c   : > { %763 = vmatprep.mubr.msk.f32.mxu0 %vm218_vm1, %v178_v13  ;;  %787 = vmatprep.mubr.msk.f32.mxu1 %vm218_vm1, %v194_v14 }
  0x1f   : > { %764 = vmatmul.mubr.msk.f32.gmra.mxu0 %vm218_vm1, %v179_v15  ;;  %788 = vmatmul.mubr.msk.f32.gmra.mxu1 %vm218_vm1, %v195_v16 }
  0x20   : > { %766 = vmatprep.mubr.msk.f32.mxu0 %vm218_vm1, %v180_v17  ;;  %790 = vmatprep.mubr.msk.f32.mxu1 %vm218_vm1, %v196_v18 }
  0x23   : > { %767 = vmatmul.mubr.msk.f32.gmra.mxu0 %vm218_vm1, %v181_v19  ;;  %791 = vmatmul.mubr.msk.f32.gmra.mxu1 %vm218_vm1, %v197_v20 }
  0x24   : > { %769 = vmatprep.mubr.msk.f32.mxu0 %vm218_vm1, %v182_v21  ;;  %793 = vmatprep.mubr.msk.f32.mxu1 %vm218_vm1, %v198_v22 }
  0x27   : > { %770 = vmatmul.mubr.msk.f32.gmra.mxu0 %vm218_vm1, %v183_v23  ;;  %794 = vmatmul.mubr.msk.f32.gmra.mxu1 %vm218_vm1, %v199_v24 }
  0x28   : > { %772 = vmatprep.mubr.msk.f32.mxu0 %vm218_vm1, %v184_v25  ;;  %796 = vmatprep.mubr.msk.f32.mxu1 %vm218_vm1, %v200_v26 }
  0x2b   : > { %773 = vmatmul.mubr.msk.f32.gmra.mxu0 %vm218_vm1, %v185_v27  ;;  %797 = vmatmul.mubr.msk.f32.gmra.mxu1 %vm218_vm1, %v201_v28 }
  0x2c   : > { %775 = vmatprep.mubr.msk.f32.mxu0 %vm218_vm1, %v186_v29  ;;  %799 = vmatprep.mubr.msk.f32.mxu1 %vm218_vm1, %v202_v30 }
  0x2f   : > { %776 = vmatmul.mubr.msk.f32.gmra.mxu0 %vm218_vm1, %v187_v31  ;;  %800 = vmatmul.mubr.msk.f32.gmra.mxu1 %vm218_vm1, %v203_v32 }
  0x30   : > { %778 = vmatprep.mubr.msk.f32.mxu0 %vm218_vm1, %v188_v33  ;;  %802 = vmatprep.mubr.msk.f32.mxu1 %vm218_vm1, %v204_v34 }
  0x33   : > { %779 = vmatmul.mubr.msk.f32.gmra.mxu0 %vm218_vm1, %v189_v35  ;;  %803 = vmatmul.mubr.msk.f32.gmra.mxu1 %vm218_vm1, %v205_v36 }
  0xd7   : > { %v759_v38 = vpop.f32.mrf.mxu0  ;;  %v783_v39 = vpop.f32.mrf.mxu1 }
  0xd8   : > { %v391_v40 = vadd.f32 %v759_v38, %v951_v37  ;;  %v471_v41 = vadd.f32 %v783_v39, %v951_v37 }
  0xd9   : > { %v385_v42 = vpop.f32.mrf.mxu0  ;;  %v465_v43 = vpop.f32.mrf.mxu1 }
  0xda   : > { %v545_v44 = vmax.f32 %v391_v40, 0.0  ;;  %v561_v45 = vmax.f32 %v471_v41, 0.0  ;;  %v386_v46 = vadd.f32 %v951_v37, %v385_v42  ;;  %v466_v47 = vadd.f32 %v951_v37, %v465_v43 }
  0xdb   : > { %v762_v48 = vpop.f32.mrf.mxu0  ;;  %v786_v49 = vpop.f32.mrf.mxu1 }
  0xdc   : > { %578 = vst.msk [vmem:[%s960_s6 + $0x8] sm:$0xff] %vm576_vm2, %v545_v44  ;;  %594 = vst.msk [vmem:[%s960_s6 + $0x88] sm:$0xff] %vm576_vm2, %v561_v45  ;;  %v544_v50 = vmax.f32 %v386_v46, 0.0  ;;  %v560_v51 = vmax.f32 %v466_v47, 0.0  ;;  %v401_v52 = vadd.f32 %v762_v48, %v951_v37  ;;  %v481_v53 = vadd.f32 %v786_v49, %v951_v37 }
  0xdd   : > { %v395_v54 = vpop.f32.mrf.mxu0  ;;  %v475_v55 = vpop.f32.mrf.mxu1 }
  0xde   : > { %577 = vst.msk [vmem:[%s960_s6] sm:$0xff] %vm576_vm2, %v544_v50  ;;  %593 = vst.msk [vmem:[%s960_s6 + $0x80] sm:$0xff] %vm576_vm2, %v560_v51  ;;  %v547_v56 = vmax.f32 %v401_v52, 0.0  ;;  %v563_v57 = vmax.f32 %v481_v53, 0.0  ;;  %v396_v58 = vadd.f32 %v951_v37, %v395_v54  ;;  %v476_v59 = vadd.f32 %v951_v37, %v475_v55 }
  0xdf   : > { %v765_v60 = vpop.f32.mrf.mxu0  ;;  %v789_v61 = vpop.f32.mrf.mxu1 }
  0xe0   : > { %580 = vst.msk [vmem:[%s960_s6 + $0x18] sm:$0xff] %vm576_vm2, %v547_v56  ;;  %596 = vst.msk [vmem:[%s960_s6 + $0x98] sm:$0xff] %vm576_vm2, %v563_v57  ;;  %v546_v62 = vmax.f32 %v396_v58, 0.0  ;;  %v562_v63 = vmax.f32 %v476_v59, 0.0  ;;  %v411_v0 = vadd.f32 %v765_v60, %v951_v37  ;;  %v491_v1 = vadd.f32 %v789_v61, %v951_v37 }
  0xe1   : > { %v405_v2 = vpop.f32.mrf.mxu0  ;;  %v485_v3 = vpop.f32.mrf.mxu1 }
  0xe2   : > { %579 = vst.msk [vmem:[%s960_s6 + $0x10] sm:$0xff] %vm576_vm2, %v546_v62  ;;  %595 = vst.msk [vmem:[%s960_s6 + $0x90] sm:$0xff] %vm576_vm2, %v562_v63  ;;  %v549_v4 = vmax.f32 %v411_v0, 0.0  ;;  %v565_v5 = vmax.f32 %v491_v1, 0.0  ;;  %v406_v6 = vadd.f32 %v951_v37, %v405_v2  ;;  %v486_v7 = vadd.f32 %v951_v37, %v485_v3 }
  0xe3   : > { %v768_v8 = vpop.f32.mrf.mxu0  ;;  %v792_v9 = vpop.f32.mrf.mxu1 }
  0xe4   : > { %582 = vst.msk [vmem:[%s960_s6 + $0x28] sm:$0xff] %vm576_vm2, %v549_v4  ;;  %598 = vst.msk [vmem:[%s960_s6 + $0xa8] sm:$0xff] %vm576_vm2, %v565_v5  ;;  %v548_v10 = vmax.f32 %v406_v6, 0.0  ;;  %v564_v11 = vmax.f32 %v486_v7, 0.0  ;;  %v421_v12 = vadd.f32 %v768_v8, %v951_v37  ;;  %v501_v13 = vadd.f32 %v792_v9, %v951_v37 }
  0xe5   : > { %v415_v14 = vpop.f32.mrf.mxu0  ;;  %v495_v15 = vpop.f32.mrf.mxu1 }
  0xe6   : > { %581 = vst.msk [vmem:[%s960_s6 + $0x20] sm:$0xff] %vm576_vm2, %v548_v10  ;;  %597 = vst.msk [vmem:[%s960_s6 + $0xa0] sm:$0xff] %vm576_vm2, %v564_v11  ;;  %v551_v16 = vmax.f32 %v421_v12, 0.0  ;;  %v567_v17 = vmax.f32 %v501_v13, 0.0  ;;  %v416_v18 = vadd.f32 %v951_v37, %v415_v14  ;;  %v496_v19 = vadd.f32 %v951_v37, %v495_v15 }
  0xe7   : > { %v771_v20 = vpop.f32.mrf.mxu0  ;;  %v795_v21 = vpop.f32.mrf.mxu1 }
  0xe8   : > { %584 = vst.msk [vmem:[%s960_s6 + $0x38] sm:$0xff] %vm576_vm2, %v551_v16  ;;  %600 = vst.msk [vmem:[%s960_s6 + $0xb8] sm:$0xff] %vm576_vm2, %v567_v17  ;;  %v550_v22 = vmax.f32 %v416_v18, 0.0  ;;  %v566_v23 = vmax.f32 %v496_v19, 0.0  ;;  %v431_v24 = vadd.f32 %v771_v20, %v951_v37  ;;  %v511_v25 = vadd.f32 %v795_v21, %v951_v37 }
  0xe9   : > { %v425_v26 = vpop.f32.mrf.mxu0  ;;  %v505_v27 = vpop.f32.mrf.mxu1 }
  0xea   : > { %583 = vst.msk [vmem:[%s960_s6 + $0x30] sm:$0xff] %vm576_vm2, %v550_v22  ;;  %599 = vst.msk [vmem:[%s960_s6 + $0xb0] sm:$0xff] %vm576_vm2, %v566_v23  ;;  %v553_v28 = vmax.f32 %v431_v24, 0.0  ;;  %v569_v29 = vmax.f32 %v511_v25, 0.0  ;;  %v426_v30 = vadd.f32 %v951_v37, %v425_v26  ;;  %v506_v31 = vadd.f32 %v951_v37, %v505_v27 }
  0xeb   : > { %v774_v32 = vpop.f32.mrf.mxu0  ;;  %v798_v33 = vpop.f32.mrf.mxu1 }
  0xec   : > { %586 = vst.msk [vmem:[%s960_s6 + $0x48] sm:$0xff] %vm576_vm2, %v553_v28  ;;  %602 = vst.msk [vmem:[%s960_s6 + $0xc8] sm:$0xff] %vm576_vm2, %v569_v29  ;;  %v552_v34 = vmax.f32 %v426_v30, 0.0  ;;  %v568_v35 = vmax.f32 %v506_v31, 0.0  ;;  %v441_v36 = vadd.f32 %v774_v32, %v951_v37  ;;  %v521_v38 = vadd.f32 %v798_v33, %v951_v37 }
  0xed   : > { %v435_v39 = vpop.f32.mrf.mxu0  ;;  %v515_v40 = vpop.f32.mrf.mxu1 }
  0xee   : > { %585 = vst.msk [vmem:[%s960_s6 + $0x40] sm:$0xff] %vm576_vm2, %v552_v34  ;;  %601 = vst.msk [vmem:[%s960_s6 + $0xc0] sm:$0xff] %vm576_vm2, %v568_v35  ;;  %v555_v41 = vmax.f32 %v441_v36, 0.0  ;;  %v571_v42 = vmax.f32 %v521_v38, 0.0  ;;  %v436_v43 = vadd.f32 %v951_v37, %v435_v39  ;;  %v516_v44 = vadd.f32 %v951_v37, %v515_v40 }
  0xef   : > { %v777_v45 = vpop.f32.mrf.mxu0  ;;  %v801_v46 = vpop.f32.mrf.mxu1 }
  0xf0   : > { %588 = vst.msk [vmem:[%s960_s6 + $0x58] sm:$0xff] %vm576_vm2, %v555_v41  ;;  %604 = vst.msk [vmem:[%s960_s6 + $0xd8] sm:$0xff] %vm576_vm2, %v571_v42  ;;  %v554_v47 = vmax.f32 %v436_v43, 0.0  ;;  %v570_v48 = vmax.f32 %v516_v44, 0.0  ;;  %v451_v49 = vadd.f32 %v777_v45, %v951_v37  ;;  %v531_v50 = vadd.f32 %v801_v46, %v951_v37 }
  0xf1   : > { %v445_v51 = vpop.f32.mrf.mxu0  ;;  %v525_v52 = vpop.f32.mrf.mxu1 }
  0xf2   : > { %587 = vst.msk [vmem:[%s960_s6 + $0x50] sm:$0xff] %vm576_vm2, %v554_v47  ;;  %603 = vst.msk [vmem:[%s960_s6 + $0xd0] sm:$0xff] %vm576_vm2, %v570_v48  ;;  %v557_v53 = vmax.f32 %v451_v49, 0.0  ;;  %v573_v54 = vmax.f32 %v531_v50, 0.0  ;;  %v446_v55 = vadd.f32 %v951_v37, %v445_v51  ;;  %v526_v56 = vadd.f32 %v951_v37, %v525_v52 }
  0xf3   : > { %v780_v57 = vpop.f32.mrf.mxu0  ;;  %v804_v58 = vpop.f32.mrf.mxu1 }
  0xf4   : > { %590 = vst.msk [vmem:[%s960_s6 + $0x68] sm:$0xff] %vm576_vm2, %v557_v53  ;;  %606 = vst.msk [vmem:[%s960_s6 + $0xe8] sm:$0xff] %vm576_vm2, %v573_v54  ;;  %v556_v59 = vmax.f32 %v446_v55, 0.0  ;;  %v572_v60 = vmax.f32 %v526_v56, 0.0  ;;  %v461_v61 = vadd.f32 %v780_v57, %v951_v37  ;;  %v541_v62 = vadd.f32 %v804_v58, %v951_v37 }
  0xf5   : > { %v455_v63 = vpop.f32.mrf.mxu0  ;;  %v535_v0 = vpop.f32.mrf.mxu1 }
  0xf6   : > { %589 = vst.msk [vmem:[%s960_s6 + $0x60] sm:$0xff] %vm576_vm2, %v556_v59  ;;  %605 = vst.msk [vmem:[%s960_s6 + $0xe0] sm:$0xff] %vm576_vm2, %v572_v60  ;;  %v559_v1 = vmax.f32 %v461_v61, 0.0  ;;  %v575_v2 = vmax.f32 %v541_v62, 0.0  ;;  %v456_v3 = vadd.f32 %v951_v37, %v455_v63  ;;  %v536_v4 = vadd.f32 %v951_v37, %v535_v0 }
  0xf8   : > { %592 = vst.msk [vmem:[%s960_s6 + $0x78] sm:$0xff] %vm576_vm2, %v559_v1  ;;  %608 = vst.msk [vmem:[%s960_s6 + $0xf8] sm:$0xff] %vm576_vm2, %v575_v2  ;;  %v558_v5 = vmax.f32 %v456_v3, 0.0  ;;  %v574_v6 = vmax.f32 %v536_v4, 0.0 }
  0xfa   : > { %591 = vst.msk [vmem:[%s960_s6 + $0x70] sm:$0xff] %vm576_vm2, %v558_v5  ;;  %607 = vst.msk [vmem:[%s960_s6 + $0xf0] sm:$0xff] %vm576_vm2, %v574_v6 }
  0xfb PF: > { %s13_s12 = sadd.s32 1, %s829_s12  }
  0xfc   : > { %p10_p4 = scmp.ge.s32.totalorder %s13_s12, 4  }
  0xfe   :  { %12 = sbr.rel (!%p10_p4) target bundleno = 1 (0x1), region = 62 }

</bundles_post_ra>
